<compile_context>
chip_gen: v7x
topology: tpu7x:2x2x1
jax: 0.10.0
libtpu: 0.0.40
codegen_flags: <defaults>
</compile_context>

<pallas_src>
import functools

import jax
import jax.numpy as jnp
from jax.experimental import pallas as pl
from jax.experimental.pallas import tpu as pltpu

LANES = 128      # vreg lane width
SUBLANES = 8     # vreg sublane count


def _subspace_kernel(t_ref, cov_ref, mean_ref, out_ref, *, rank):
    # t_ref:    (rank,)           float32 in SMEM (whole vector, shared by all steps)
    # cov_ref:  (rank, tr, 128)   VMEM row-tile of cov_factor
    # mean_ref: (tr, 128)         VMEM row-tile of mean
    # out_ref:  (tr, 128)         VMEM row-tile of the output
    #
    # Pure-VPU reduction over rank (no MXU). rank is small and static, so the
    # Python loop fully unrolls; each step is a scalar-splat multiply-add on the tile.
    acc = mean_ref[...]
    for k in range(rank):
        acc = acc + t_ref[k] * cov_ref[k]
    out_ref[...] = acc.astype(out_ref.dtype)


def subspace_forward(mean, cov_factor, t, *, tile_rows=None):
    """mean: (D,), cov_factor: (rank, D), t: (rank,)  ->  (D,) float32."""
    rank, D = cov_factor.shape
    assert mean.shape == (D,)
    assert t.shape == (rank,)

    # Pad D up to a multiple of 128 lanes (only copies when D is ragged).
    Dp = -(-D // LANES) * LANES
    R = Dp // LANES

    mean_f = mean.astype(jnp.float32)
    cov_f = cov_factor.astype(jnp.float32)
    if Dp != D:
        # TODO(synk): ragged D costs one extra pass over cov_factor for the lane-pad copy.
        mean_f = jnp.pad(mean_f, (0, Dp - D))
        cov_f = jnp.pad(cov_f, ((0, 0), (0, Dp - D)))

    # Row-major reshapes are free (no copy): (Dp,) -> (R, 128), (rank, Dp) -> (rank, R, 128).
    mean2 = mean_f.reshape(R, LANES)
    cov3 = cov_f.reshape(rank, R, LANES)
    t1 = t.astype(jnp.float32)

    if tile_rows is None:
        # Double-buffered VMEM footprint: 2 * (rank + 2) * tile_rows * 128 * 4 B <= ~12 MiB.
        cap = (12 * 1024 * 1024) // (2 * (rank + 2) * LANES * 4)
        cap = max(SUBLANES, (cap // SUBLANES) * SUBLANES)
        if R <= 256:
            # Small problem: single grid step -> one DMA-in / compute / DMA-out,
            # no pipeline overhead.  tile_rows == full dim, so any R is legal.
            tile_rows = R
        else:
            tile_rows = min(1024, cap)
            # Keep >= 2 grid steps so the "parallel" axis can split across TensorCores.
            half = -(-((R + 1) // 2) // SUBLANES) * SUBLANES
            tile_rows = min(tile_rows, half)

    num_tiles = -(-R // tile_rows)   # last block may be partial; Pallas masks the edge

    kernel = functools.partial(_subspace_kernel, rank=rank)

    out = pl.pallas_call(
        kernel,
        out_shape=jax.ShapeDtypeStruct((R, LANES), jnp.float32),
        grid_spec=pltpu.PrefetchScalarGridSpec(
            num_scalar_prefetch=0,
            grid=(num_tiles,),
            in_specs=[
                pl.BlockSpec(memory_space=pltpu.MemorySpace.SMEM),              # t (whole, SMEM)
                pl.BlockSpec((rank, tile_rows, LANES), lambda j: (0, j, 0)),    # cov row-tile
                pl.BlockSpec((tile_rows, LANES), lambda j: (j, 0)),             # mean row-tile
            ],
            out_specs=pl.BlockSpec((tile_rows, LANES), lambda j: (j, 0)),
        ),
        compiler_params=pltpu.CompilerParams(
            # Independent output tiles -> shard grid across TensorCores (v7x megacore).
            dimension_semantics=("parallel",),
        ),
    )(t1, cov3, mean2)

    return out.reshape(Dp)[:D]


if __name__ == "__main__":
    keys = jax.random.split(jax.random.PRNGKey(0), 9)

    # Primary example: rank=8, D=1024 (small -> single grid step, no padding).
    rank, D = 8, 1024
    mean = jax.random.normal(keys[0], (D,), dtype=jnp.float32)
    cov_factor = jax.random.normal(keys[1], (rank, D), dtype=jnp.float32)
    t = jax.random.normal(keys[2], (rank,), dtype=jnp.float32)

    out = jax.block_until_ready(subspace_forward(mean, cov_factor, t))
    ref = mean + cov_factor.T @ t
    assert out.shape == (D,)
    assert jnp.allclose(out, ref, atol=1e-5, rtol=1e-5), "mismatch vs reference"

    # Ragged case: D not a multiple of 128, odd rank (exercises the lane-pad path).
    rank2, D2 = 5, 1000
    mean_b = jax.random.normal(keys[3], (D2,), dtype=jnp.float32)
    cov_b = jax.random.normal(keys[4], (rank2, D2), dtype=jnp.float32)
    t_b = jax.random.normal(keys[5], (rank2,), dtype=jnp.float32)

    out_b = jax.block_until_ready(subspace_forward(mean_b, cov_b, t_b))
    ref_b = mean_b + cov_b.T @ t_b
    assert out_b.shape == (D2,)
    assert jnp.allclose(out_b, ref_b, atol=1e-5, rtol=1e-5), "mismatch vs reference (ragged)"

    # Multi-tile case: exercises the >1 grid step + masked edge-block path.
    rank3, D3 = 3, 40000
    mean_c = jax.random.normal(keys[6], (D3,), dtype=jnp.float32)
    cov_c = jax.random.normal(keys[7], (rank3, D3), dtype=jnp.float32)
    t_c = jax.random.normal(keys[8], (rank3,), dtype=jnp.float32)

    out_c = jax.block_until_ready(subspace_forward(mean_c, cov_c, t_c))
    ref_c = mean_c + cov_c.T @ t_c
    assert out_c.shape == (D3,)
    assert jnp.allclose(out_c, ref_c, atol=1e-5, rtol=1e-5), "mismatch vs reference (multi-tile)"

    print("KERNEL_OK")
</pallas_src>

<mosaic_0001>
module attributes {stable_mosaic.version = 11 : i64} {
  func.func @_subspace_kernel(%arg0: i32, %arg1: memref<8xf32, #tpu.memory_space<smem>>, %arg2: memref<8x8x128xf32, #tpu.memory_space<vmem>>, %arg3: memref<8x128xf32, #tpu.memory_space<vmem>>, %arg4: memref<8x128xf32, #tpu.memory_space<vmem>>) attributes {dimension_semantics = [#tpu.dimension_semantics<parallel>], iteration_bounds = array<i64: 1>, scalar_prefetch = 0 : i64, scratch_operands = 0 : i64, tpu.core_type = #tpu.core_type<tc>, window_params = [{transform_indices = @transform_0, window_bounds = array<i64: 8>}, {transform_indices = @transform_1, window_bounds = array<i64: 8, 8, 128>}, {transform_indices = @transform_2, window_bounds = array<i64: 8, 128>}, {transform_indices = @transform_3, window_bounds = array<i64: 8, 128>}]} {
    %c0 = arith.constant 0 : index
    %c0_0 = arith.constant 0 : index
    %0 = vector.load %arg3[%c0, %c0_0] : memref<8x128xf32, #tpu.memory_space<vmem>>, vector<8x128xf32>
    %c0_1 = arith.constant 0 : index
    %1 = memref.load %arg1[%c0_1] : memref<8xf32, #tpu.memory_space<smem>>
    %c0_2 = arith.constant 0 : index
    %c0_3 = arith.constant 0 : index
    %c0_4 = arith.constant 0 : index
    %2 = vector.load %arg2[%c0_2, %c0_3, %c0_4] : memref<8x8x128xf32, #tpu.memory_space<vmem>>, vector<1x8x128xf32>
    %3 = vector.shape_cast %2 : vector<1x8x128xf32> to vector<8x128xf32>
    %4 = vector.broadcast %1 : f32 to vector<8x128xf32>
    %5 = arith.mulf %4, %3 : vector<8x128xf32>
    %6 = arith.addf %0, %5 : vector<8x128xf32>
    %c1 = arith.constant 1 : index
    %7 = memref.load %arg1[%c1] : memref<8xf32, #tpu.memory_space<smem>>
    %c1_5 = arith.constant 1 : index
    %c0_6 = arith.constant 0 : index
    %c0_7 = arith.constant 0 : index
    %8 = vector.load %arg2[%c1_5, %c0_6, %c0_7] : memref<8x8x128xf32, #tpu.memory_space<vmem>>, vector<1x8x128xf32>
    %9 = vector.shape_cast %8 : vector<1x8x128xf32> to vector<8x128xf32>
    %10 = vector.broadcast %7 : f32 to vector<8x128xf32>
    %11 = arith.mulf %10, %9 : vector<8x128xf32>
    %12 = arith.addf %6, %11 : vector<8x128xf32>
    %c2 = arith.constant 2 : index
    %13 = memref.load %arg1[%c2] : memref<8xf32, #tpu.memory_space<smem>>
    %c2_8 = arith.constant 2 : index
    %c0_9 = arith.constant 0 : index
    %c0_10 = arith.constant 0 : index
    %14 = vector.load %arg2[%c2_8, %c0_9, %c0_10] : memref<8x8x128xf32, #tpu.memory_space<vmem>>, vector<1x8x128xf32>
    %15 = vector.shape_cast %14 : vector<1x8x128xf32> to vector<8x128xf32>
    %16 = vector.broadcast %13 : f32 to vector<8x128xf32>
    %17 = arith.mulf %16, %15 : vector<8x128xf32>
    %18 = arith.addf %12, %17 : vector<8x128xf32>
    %c3 = arith.constant 3 : index
    %19 = memref.load %arg1[%c3] : memref<8xf32, #tpu.memory_space<smem>>
    %c3_11 = arith.constant 3 : index
    %c0_12 = arith.constant 0 : index
    %c0_13 = arith.constant 0 : index
    %20 = vector.load %arg2[%c3_11, %c0_12, %c0_13] : memref<8x8x128xf32, #tpu.memory_space<vmem>>, vector<1x8x128xf32>
    %21 = vector.shape_cast %20 : vector<1x8x128xf32> to vector<8x128xf32>
    %22 = vector.broadcast %19 : f32 to vector<8x128xf32>
    %23 = arith.mulf %22, %21 : vector<8x128xf32>
    %24 = arith.addf %18, %23 : vector<8x128xf32>
    %c4 = arith.constant 4 : index
    %25 = memref.load %arg1[%c4] : memref<8xf32, #tpu.memory_space<smem>>
    %c4_14 = arith.constant 4 : index
    %c0_15 = arith.constant 0 : index
    %c0_16 = arith.constant 0 : index
    %26 = vector.load %arg2[%c4_14, %c0_15, %c0_16] : memref<8x8x128xf32, #tpu.memory_space<vmem>>, vector<1x8x128xf32>
    %27 = vector.shape_cast %26 : vector<1x8x128xf32> to vector<8x128xf32>
    %28 = vector.broadcast %25 : f32 to vector<8x128xf32>
    %29 = arith.mulf %28, %27 : vector<8x128xf32>
    %30 = arith.addf %24, %29 : vector<8x128xf32>
    %c5 = arith.constant 5 : index
    %31 = memref.load %arg1[%c5] : memref<8xf32, #tpu.memory_space<smem>>
    %c5_17 = arith.constant 5 : index
    %c0_18 = arith.constant 0 : index
    %c0_19 = arith.constant 0 : index
    %32 = vector.load %arg2[%c5_17, %c0_18, %c0_19] : memref<8x8x128xf32, #tpu.memory_space<vmem>>, vector<1x8x128xf32>
    %33 = vector.shape_cast %32 : vector<1x8x128xf32> to vector<8x128xf32>
    %34 = vector.broadcast %31 : f32 to vector<8x128xf32>
    %35 = arith.mulf %34, %33 : vector<8x128xf32>
    %36 = arith.addf %30, %35 : vector<8x128xf32>
    %c6 = arith.constant 6 : index
    %37 = memref.load %arg1[%c6] : memref<8xf32, #tpu.memory_space<smem>>
    %c6_20 = arith.constant 6 : index
    %c0_21 = arith.constant 0 : index
    %c0_22 = arith.constant 0 : index
    %38 = vector.load %arg2[%c6_20, %c0_21, %c0_22] : memref<8x8x128xf32, #tpu.memory_space<vmem>>, vector<1x8x128xf32>
    %39 = vector.shape_cast %38 : vector<1x8x128xf32> to vector<8x128xf32>
    %40 = vector.broadcast %37 : f32 to vector<8x128xf32>
    %41 = arith.mulf %40, %39 : vector<8x128xf32>
    %42 = arith.addf %36, %41 : vector<8x128xf32>
    %c7 = arith.constant 7 : index
    %43 = memref.load %arg1[%c7] : memref<8xf32, #tpu.memory_space<smem>>
    %c7_23 = arith.constant 7 : index
    %c0_24 = arith.constant 0 : index
    %c0_25 = arith.constant 0 : index
    %44 = vector.load %arg2[%c7_23, %c0_24, %c0_25] : memref<8x8x128xf32, #tpu.memory_space<vmem>>, vector<1x8x128xf32>
    %45 = vector.shape_cast %44 : vector<1x8x128xf32> to vector<8x128xf32>
    %46 = vector.broadcast %43 : f32 to vector<8x128xf32>
    %47 = arith.mulf %46, %45 : vector<8x128xf32>
    %48 = arith.addf %42, %47 : vector<8x128xf32>
    %c0_26 = arith.constant 0 : index
    %c0_27 = arith.constant 0 : index
    %49 = vector.load %arg4[%c0_26, %c0_27] : memref<8x128xf32, #tpu.memory_space<vmem>>, vector<8x128xf32>
    tpu.vector_store %arg4[%c0_26, %c0_27], %48 {strides = array<i32>} : memref<8x128xf32, #tpu.memory_space<vmem>>, vector<8x128xf32>,
    return
  }
  func.func @transform_0(%arg0: i32) -> i32 {
    %c0_i32 = arith.constant 0 : i32
    %c0_i32_0 = arith.constant 0 : i32
    return %c0_i32 : i32
  }
  func.func @transform_1(%arg0: i32) -> (i32, i32, i32) {
    %c0_i32 = arith.constant 0 : i32
    %c0_i32_0 = arith.constant 0 : i32
    %c0_i32_1 = arith.constant 0 : i32
    return %c0_i32, %arg0, %c0_i32_0 : i32, i32, i32
  }
  func.func @transform_2(%arg0: i32) -> (i32, i32) {
    %c0_i32 = arith.constant 0 : i32
    %c0_i32_0 = arith.constant 0 : i32
    return %arg0, %c0_i32 : i32, i32
  }
  func.func @transform_3(%arg0: i32) -> (i32, i32) {
    %c0_i32 = arith.constant 0 : i32
    %c0_i32_0 = arith.constant 0 : i32
    return %arg0, %c0_i32 : i32, i32
  }
}

</mosaic_0001>

<bundles_post_ra>
// kernel: tpu_custom_call.1
= control target key start
LH: loop header
LB: loop body
LE: loop exit
PB: predicated region body
PF: predicated region fallthrough
CT: control target
= control target key end

     0   :  { %8 = vsyncpa [#allocation5], 0  ;;  %s289_s0 = inlined_call_operand.hbm [shape: f32[8], index: 0, kind: input, shape index: {}]   ;;  %s290_s1 = inlined_call_operand.hbm [shape: f32[8,8,128], index: 1, kind: input, shape index: {}]   ;;  %s291_s2 = inlined_call_operand.hbm [shape: f32[8,128], index: 2, kind: input, shape index: {}]   ;;  %s292_s3 = inlined_call_operand.hbm [shape: f32[8,128], index: 3, kind: output, shape index: {}]  }
   0x1   :  { %9 = vsyncpa [#allocation3], 0 }
   0x2   :  { %10 = vsyncpa [#allocation8], 0 }
   0x3   :  { %11 = vsyncpa [#allocation4], 0  ;;  %s131_s14 = scalar_lea.hbm %s289_s0, 16 }
   0x4   :  { %p132_p0 = scmp.ne.s32.totalorder %s289_s0, %s131_s14  ;;  %p135_p1 = scmp.lt.u32.totalorder %s131_s14, %s289_s0 }
   0x6   :  { %p137_p2 = pnand %p135_p1, %p132_p0 }
   0x8   :  { %140 = shalt.err (!%p137_p2)
}
   0x9   :  { %s215_s19 = smov [#allocation2]   ;;  %s216_s22 = smov [#allocation6]  }
   0xa   :  { %19 = dma.hbm_to_smem %s289_s0, 16, %s215_s19, [#allocation5]  }
   0xb   :  { %s25_s23 = sshll.u32 %s216_s22, 4  ;;  %s141_s26 = scalar_lea.hbm %s290_s1, 1024  ;;  %s26_s23 = int_to_ptr.vmem [resolvable:$true] %s25_s23 }
   0xc   :  { %p142_p3 = scmp.ne.s32.totalorder %s290_s1, %s141_s26  ;;  %p145_p4 = scmp.lt.u32.totalorder %s141_s26, %s290_s1 }
   0xe   :  { %p147_p5 = pnand %p145_p4, %p142_p3 }
  0x10   :  { %150 = shalt.err (!%p147_p5)
}
  0x11   :  { %s151_s4 = scalar_lea.vmem %s26_s23, 1024  ;;  %p156_p7 = scmp.lt.s32.totalorder %s26_s23, %s26_s23 }
  0x12   :  { %p152_p6 = scmp.ne.s32.totalorder %s26_s23, %s151_s4  ;;  %p157_p8 = scmp.lt.s32.totalorder %s151_s4, %s151_s4 }
  0x14   :  { %p158_p9 = por %p157_p8, %p156_p7 }
  0x16   :  { %p159_p10 = pnand %p158_p9, %p152_p6 }
  0x18   :  { %162 = shalt.err (!%p159_p10)
}
  0x19   :  { %s217_s0 = smov 128   ;;  %s218_s5 = smov 8  }
  0x1a   :  { %31 = dma.hbm_to_vmem [thread:$0]  %s290_s1, 1024, %s26_s23, [#allocation3], %s217_s0, %s217_s0, %s218_s5  }
  0x1b   :  { %s219_s8 = smov [#allocation7]   ;;  %s163_s12 = scalar_lea.hbm %s291_s2, 128 }
  0x1c   :  { %s38_s9 = sshll.u32 %s219_s8, 4  ;;  %p164_p11 = scmp.ne.s32.totalorder %s291_s2, %s163_s12  ;;  %s39_s9 = int_to_ptr.vmem [resolvable:$true] %s38_s9 }
  0x1d   :  { %p167_p12 = scmp.lt.u32.totalorder %s163_s12, %s291_s2 }
  0x1f   :  { %p169_p13 = pnand %p167_p12, %p164_p11 }
  0x21   :  { %172 = shalt.err (!%p169_p13)
}
  0x22   :  { %s173_s17 = scalar_lea.vmem %s39_s9, 128  ;;  %p178_p1 = scmp.lt.s32.totalorder %s39_s9, %s39_s9 }
  0x23   :  { %p174_p0 = scmp.ne.s32.totalorder %s39_s9, %s173_s17  ;;  %p179_p2 = scmp.lt.s32.totalorder %s173_s17, %s173_s17 }
  0x25   :  { %p180_p3 = por %p179_p2, %p178_p1 }
  0x27   :  { %p181_p4 = pnand %p180_p3, %p174_p0 }
  0x29   :  { %184 = shalt.err (!%p181_p4)
}
  0x2a   :  { %41 = dma.hbm_to_vmem [thread:$0]  %s291_s2, 128, %s39_s9, [#allocation8]  }
  0x2b   :  { %207 = dma.done.wait [#allocation5], 16  }
  0x2c   :  { %208 = vsyncadd [#allocation5], 4294967280 }
  0x2d   :  { %209 = dma.done.wait [#allocation3], 1024  }
  0x2e   :  { %210 = vsyncadd [#allocation3], 4294966272 }
  0x2f   :  { %211 = dma.done.wait [#allocation8], 128  }
  0x30   :  { %212 = vsyncadd [#allocation8], 4294967168 }
  0x31   :  { %51 = sfence }
  0x32   :  { %s53_s19 = sld [smem:[#allocation2]]  ;;  %s118_s20 = sld [smem:[#allocation2 + $0x1]]  ;;  %v54_v0 = vld [vmem:[#allocation6] sm:$0xff]  ;;  %v60_v1 = vld [vmem:[#allocation6 + $0x8] sm:$0xff]  ;;  %v66_v5 = vld [vmem:[#allocation6 + $0x10] sm:$0xff] }
  0x33   :  { %s119_s21 = sld [smem:[#allocation2 + $0x2]]  ;;  %s120_s22 = sld [smem:[#allocation2 + $0x3]]  ;;  %v52_v2 = vld [vmem:[#allocation7] sm:$0xff]  ;;  %v72_v9 = vld [vmem:[#allocation6 + $0x18] sm:$0xff]  ;;  %v84_v17 = vld [vmem:[#allocation6 + $0x28] sm:$0xff] }
  0x34   :  { %s121_s23 = sld [smem:[#allocation2 + $0x4]]  ;;  %s122_s24 = sld [smem:[#allocation2 + $0x5]]  ;;  %v78_v13 = vld [vmem:[#allocation6 + $0x20] sm:$0xff]  ;;  %v90_v21 = vld [vmem:[#allocation6 + $0x30] sm:$0xff]  ;;  %v96_v25 = vld [vmem:[#allocation6 + $0x38] sm:$0xff] }
  0x35   :  { %s123_s2 = sld [smem:[#allocation2 + $0x6]]  ;;  %s124_s25 = sld [smem:[#allocation2 + $0x7]] }
  0x36   :  { %s220_s26 = smov [#allocation9]  }
  0x37   :  { %s107_s27 = sshll.u32 %s220_s26, 4  ;;  %s108_s27 = int_to_ptr.vmem [resolvable:$true] %s107_s27 }
  0x38   :  { %v55_v3 = vstv %s53_s19  ;;  %v61_v4 = vstv %s118_s20  ;;  %s185_s28 = scalar_lea.vmem %s108_s27, 128  ;;  %p190_p6 = scmp.lt.s32.totalorder %s108_s27, %s108_s27 }
  0x39   :  { %v56_v6 = vmul.f32 %v55_v3, %v54_v0  ;;  %v62_v7 = vmul.f32 %v61_v4, %v60_v1  ;;  %v67_v8 = vstv %s119_s21  ;;  %v73_v10 = vstv %s120_s22  ;;  %p186_p5 = scmp.ne.s32.totalorder %s108_s27, %s185_s28  ;;  %p191_p7 = scmp.lt.s32.totalorder %s185_s28, %s185_s28 }
  0x3a   :  { %v68_v12 = vmul.f32 %v67_v8, %v66_v5  ;;  %v79_v14 = vstv %s121_s23  ;;  %v74_v16 = vmul.f32 %v73_v10, %v72_v9  ;;  %v85_v18 = vstv %s122_s24 }
  0x3b   :  { %v57_v11 = vadd.f32 %v56_v6, %v52_v2  ;;  %v80_v20 = vmul.f32 %v79_v14, %v78_v13  ;;  %v91_v22 = vstv %s123_s2  ;;  %v86_v24 = vmul.f32 %v85_v18, %v84_v17  ;;  %p192_p8 = por %p191_p7, %p190_p6 }
  0x3c   :  { %v97_v26 = vstv %s124_s25  ;;  %v92_v28 = vmul.f32 %v91_v22, %v90_v21 }
  0x3d   :  { %v63_v15 = vadd.f32 %v62_v7, %v57_v11  ;;  %v98_v30 = vmul.f32 %v97_v26, %v96_v25  ;;  %p193_p9 = pnand %p192_p8, %p186_p5 }
  0x3f   :  { %v69_v19 = vadd.f32 %v68_v12, %v63_v15 }
  0x41   :  { %v75_v23 = vadd.f32 %v74_v16, %v69_v19 }
  0x43   :  { %v81_v27 = vadd.f32 %v80_v20, %v75_v23 }
  0x45   :  { %v87_v29 = vadd.f32 %v86_v24, %v81_v27 }
  0x47   :  { %v93_v31 = vadd.f32 %v92_v28, %v87_v29 }
  0x49   :  { %v99_v32 = vadd.f32 %v98_v30, %v93_v31 }
  0x4b   :  { %100 = vst [vmem:[#allocation9] sm:$0xff] %v99_v32 }
  0x4c   :  { %196 = shalt.err (!%p193_p9)
}
  0x4d   :  { %s197_s4 = scalar_lea.hbm %s292_s3, 128 }
  0x4e   :  { %p198_p10 = scmp.ne.s32.totalorder %s292_s3, %s197_s4  ;;  %p201_p11 = scmp.lt.u32.totalorder %s197_s4, %s292_s3 }
  0x50   :  { %p203_p12 = pnand %p201_p11, %p198_p10 }
  0x52   :  { %206 = shalt.err (!%p203_p12)
}
  0x53   :  { %110 = dma.vmem_to_hbm [thread:$0]  %s108_s27, 128, %s292_s3, [#allocation4]  }
  0x54   :  { %213 = dma.done.wait [#allocation4], 128  }
  0x55   :  { %214 = vsyncadd [#allocation4], 4294967168 }
  0x56   :  { %114 = vsyncpa [#allocation3], 1 }
  0x57   :  { %115 = vsyncpa [#allocation8], 1 }
  0x58   :  { %116 = vsyncpa [#allocation4], 1 }
  0x59   :  { %117 = vsyncpa [#allocation5], 1 }

</bundles_post_ra>
